<compile_context>
chip_gen: v6e
topology: v6e:2x2x1
jax: 0.10.0
libtpu: 0.0.40
codegen_flags: <defaults>
</compile_context>

<pallas_src>
import jax
import jax.numpy as jnp
from jax.experimental import pallas as pl
from jax.experimental.pallas import tpu as pltpu

# Conservative fallback: v7x has the smallest physical VMEM (64 MiB per TC).
_FALLBACK_VMEM_BYTES = 64 * 1024 * 1024


def _vmem_capacity_bytes() -> int:
    """Per-generation VMEM capacity, with a v7x-safe fallback."""
    try:
        info = pltpu.get_tpu_info()
        cap = int(getattr(info, "vmem_capacity_bytes", 0) or 0)
        if cap > 0:
            return cap
    except Exception:
        pass
    return _FALLBACK_VMEM_BYTES


def _budgets():
    """(block_budget_bytes, vmem_limit_bytes) sized for 2×in + 2×out buffers."""
    cap = _vmem_capacity_bytes()
    vmem_limit = max(16 * 1024 * 1024, min(cap // 2, 64 * 1024 * 1024))
    # 4 double-buffered tiles + headroom.
    block_budget = max(1 * 1024 * 1024, vmem_limit // 6)
    return block_budget, vmem_limit


def _sublane(dtype) -> int:
    """Sublane packing for the dtype: 8 (f32), 16 (bf16/f16), 32 (int8/fp8)."""
    itemsize = jnp.dtype(dtype).itemsize
    return max(8, 32 // max(itemsize, 1))


def _flat_view_shape(m: int, n: int, k: int):
    """Pick a lane-dense (rows, cols) factorization with cols % 128 == 0 if possible."""
    total = m * n * k
    if (n * k) % 128 == 0:
        return m, n * k
    if k % 128 == 0:
        return m * n, k
    if total % 128 == 0:
        cols = 128
        c = 256
        while total % c == 0 and c <= 32768:
            cols = c
            c *= 2
        return total // cols, cols
    # Fallback: lane dim < 128 → masked partial stores, still correct.
    return m, n * k


def _pick_tiles(rows: int, cols: int, itemsize: int, sublane: int, block_budget: int):
    """Choose (tm, tc) block shape within the budget; column-tile wide rows."""
    row_bytes = cols * itemsize
    total_bytes = rows * row_bytes

    if sublane * row_bytes <= block_budget:
        # Full-width blocks; take the largest sublane-aligned row tile in budget.
        tc = cols
        max_tm = (block_budget // max(row_bytes, 1)) // sublane * sublane
        if max_tm >= rows or rows <= sublane:
            tm = rows
            # Large single-block case: force >= 2 row steps so both v7x
            # TensorCores participate in the copy (grid axis is "parallel").
            if rows >= 2 * sublane and total_bytes >= (2 << 20):
                tm = min(rows, ((pl.cdiv(rows, 2) + sublane - 1) // sublane) * sublane)
        else:
            tm = max(sublane, max_tm)
    else:
        # Very wide rows: tile columns in multiples of 128 to bound VMEM use.
        tm = rows if rows <= sublane else sublane
        tc = (block_budget // (max(tm, 1) * itemsize)) // 128 * 128
        tc = max(128, min(tc, cols))
    return tm, tc


def _identity_kernel(w_ref, o_ref):
    # Pure pass-through of the current tile.
    o_ref[...] = w_ref[...]


def _identity_pallas_copy(weight: jax.Array) -> jax.Array:
    """Materializing pass-through: copies `weight` through a Pallas kernel."""
    m, n, k = weight.shape
    rows, cols = _flat_view_shape(m, n, k)
    flat = weight.reshape(rows, cols)

    itemsize = jnp.dtype(weight.dtype).itemsize
    sublane = _sublane(weight.dtype)
    block_budget, vmem_limit = _budgets()
    tm, tc = _pick_tiles(rows, cols, itemsize, sublane, block_budget)

    grid = (pl.cdiv(rows, tm), pl.cdiv(cols, tc))

    out_flat = pl.pallas_call(
        _identity_kernel,
        out_shape=jax.ShapeDtypeStruct((rows, cols), weight.dtype),
        grid=grid,
        in_specs=[pl.BlockSpec((tm, tc), lambda i, j: (i, j))],
        out_specs=pl.BlockSpec((tm, tc), lambda i, j: (i, j)),
        compiler_params=pltpu.CompilerParams(
            dimension_semantics=("parallel", "parallel"),
            vmem_limit_bytes=vmem_limit,
        ),
    )(flat)

    return out_flat.reshape(m, n, k)


def identity_layer_3d(weight: jax.Array, *, materialize: bool = False) -> jax.Array:
    """Forward pass of IdentityLayer3D: returns `weight`.

    By default this short-circuits (no kernel launch, no HBM traffic), which is
    the correct and fastest realization of a pure pass-through. Set
    `materialize=True` to force a fresh buffer via the Pallas copy kernel.
    """
    if not materialize:
        return weight
    return _identity_pallas_copy(weight)


if __name__ == "__main__":
    # Deterministic parameter init (equivalent of torch.nn.init.normal_).
    m, n, k = 4, 8, 32
    key = jax.random.PRNGKey(0)
    weight = jax.random.normal(key, (m, n, k), dtype=jnp.float32)

    # Fast path: true identity (no kernel).
    out_fast = identity_layer_3d(weight)

    # Kernel path: exercise the Pallas pass-through once on TPU.
    out_kernel = identity_layer_3d(weight, materialize=True)
    out_kernel = jax.block_until_ready(out_kernel)

    assert out_fast.shape == (m, n, k) and out_fast.dtype == jnp.float32
    assert out_kernel.shape == (m, n, k) and out_kernel.dtype == jnp.float32
    assert bool(jnp.array_equal(out_fast, weight))
    assert bool(jnp.array_equal(out_kernel, weight))

    print("KERNEL_OK")
</pallas_src>

<mosaic_0001>
module attributes {stable_mosaic.version = 11 : i64} {
  func.func @_identity_kernel(%arg0: i32, %arg1: i32, %arg2: memref<4x256xf32, #tpu.memory_space<vmem>>, %arg3: memref<4x256xf32, #tpu.memory_space<vmem>>) attributes {dimension_semantics = [#tpu.dimension_semantics<parallel>, #tpu.dimension_semantics<parallel>], iteration_bounds = array<i64: 1, 1>, scalar_prefetch = 0 : i64, scratch_operands = 0 : i64, tpu.core_type = #tpu.core_type<tc>, window_params = [{transform_indices = @transform_0, window_bounds = array<i64: 4, 256>}, {transform_indices = @transform_1, window_bounds = array<i64: 4, 256>}]} {
    %c0 = arith.constant 0 : index
    %c0_0 = arith.constant 0 : index
    %0 = vector.load %arg2[%c0, %c0_0] : memref<4x256xf32, #tpu.memory_space<vmem>>, vector<4x256xf32>
    %c0_1 = arith.constant 0 : index
    %c0_2 = arith.constant 0 : index
    %1 = vector.load %arg3[%c0_1, %c0_2] : memref<4x256xf32, #tpu.memory_space<vmem>>, vector<4x256xf32>
    tpu.vector_store %arg3[%c0_1, %c0_2], %0 {strides = array<i32>} : memref<4x256xf32, #tpu.memory_space<vmem>>, vector<4x256xf32>,
    return
  }
  func.func @transform_0(%arg0: i32, %arg1: i32) -> (i32, i32) {
    %c0_i32 = arith.constant 0 : i32
    return %arg0, %arg1 : i32, i32
  }
  func.func @transform_1(%arg0: i32, %arg1: i32) -> (i32, i32) {
    %c0_i32 = arith.constant 0 : i32
    return %arg0, %arg1 : i32, i32
  }
}

</mosaic_0001>

<bundles_post_ra>
// kernel: tpu_custom_call.1
= control target key start
LH: loop header
LB: loop body
LE: loop exit
PB: predicated region body
PF: predicated region fallthrough
CT: control target
= control target key end

     0   :  { %6 = vsyncpa [#allocation3], 0  ;;  %s102_s0 = inlined_call_operand.hbm [shape: f32[4,256], index: 0, kind: input, shape index: {}]   ;;  %s103_s1 = inlined_call_operand.hbm [shape: f32[4,256], index: 1, kind: output, shape index: {}]  }
   0x1   :  { %7 = vsyncpa [#allocation4], 0  ;;  %s84_s6 = smov [#allocation2]  }
   0x2   :  { %s14_s7 = sshll.u32 %s84_s6, 4  ;;  %s15_s7 = int_to_ptr.vmem [resolvable:$true] %s14_s7 }
   0x3   :  { %s48_s8 = scalar_lea.vmem %s15_s7, 128  ;;  %p53_p1 = scmp.lt.s32.totalorder %s15_s7, %s15_s7 }
   0x4   :  { %p49_p0 = scmp.ne.s32.totalorder %s15_s7, %s48_s8  ;;  %p54_p2 = scmp.lt.s32.totalorder %s48_s8, %s48_s8 }
   0x6   :  { %p55_p3 = por %p54_p2, %p53_p1 }
   0x8   :  { %p56_p4 = pnand %p55_p3, %p49_p0 }
   0xa   :  { %59 = shalt.err (!%p56_p4)
}
   0xb   :  { %17 = dma.hbm_to_vmem [thread:$0]  %s102_s0, 128, %s15_s7, [#allocation3]  }
   0xc   :  { %80 = dma.done.wait [#allocation3], 128  }
   0xd   :  { %81 = vsyncadd [#allocation3], 4294967168  ;;  %s85_s11 = smov [#allocation5]   ;;  %v21_v0 = vld [vmem:[#allocation2] sm:$0xff] }
   0xe   :  { %s29_s12 = sshll.u32 %s85_s11, 4  ;;  %22 = vst [vmem:[#allocation5] sm:$0xff] %v21_v0  ;;  %s30_s12 = int_to_ptr.vmem [resolvable:$true] %s29_s12 }
   0xf   :  { %s60_s13 = scalar_lea.vmem %s30_s12, 128  ;;  %p65_p6 = scmp.lt.s32.totalorder %s30_s12, %s30_s12 }
  0x10   :  { %p61_p5 = scmp.ne.s32.totalorder %s30_s12, %s60_s13  ;;  %p66_p7 = scmp.lt.s32.totalorder %s60_s13, %s60_s13 }
  0x12   :  { %p67_p8 = por %p66_p7, %p65_p6 }
  0x14   :  { %p68_p9 = pnand %p67_p8, %p61_p5 }
  0x16   :  { %71 = shalt.err (!%p68_p9)
}
  0x17   :  { %32 = dma.vmem_to_hbm [thread:$0]  %s30_s12, 128, %s103_s1, [#allocation4]  }
  0x18   :  { %82 = dma.done.wait [#allocation4], 128  }
  0x19   :  { %83 = vsyncadd [#allocation4], 4294967168 }
  0x1a   :  { %36 = vsyncpa [#allocation3], 1 }
  0x1b   :  { %37 = vsyncpa [#allocation4], 1 }

</bundles_post_ra>
